<compile_context>
chip_gen: v7x
topology: tpu7x:2x2x1
jax: 0.10.0
libtpu: 0.0.40
codegen_flags: <defaults>
</compile_context>

<pallas_src>
import jax
import jax.numpy as jnp
from jax.experimental import pallas as pl
from jax.experimental.pallas import tpu as pltpu

H1 = 400          # logical hidden sizes (PyTorch module)
H2 = 300
H1_PAD = 512      # zero-padded to lane multiples for full (8,128) tiles
H2_PAD = 384


def _round_up(n, m):
    return ((n + m - 1) // m) * m


def critic_kernel(x_ref, u_ref, w1x_ref, w1u_ref, b1_ref, w2_ref, b2_ref,
                  w3_ref, b3_ref, o_ref):
    # Layer 1: split matmul replaces cat([x, u], 1) @ w1.  bf16 MXU inputs,
    # f32 accumulation, f32 bias + ReLU.
    x = x_ref[...].astype(jnp.bfloat16)
    u = u_ref[...].astype(jnp.bfloat16)
    h1 = (jnp.dot(x, w1x_ref[...], preferred_element_type=jnp.float32)
          + jnp.dot(u, w1u_ref[...], preferred_element_type=jnp.float32)
          + b1_ref[...])
    h1 = jnp.maximum(h1, 0.0)

    # Layer 2 (K = 512, N = 384 -> fully lane-aligned after padding).
    h2 = jnp.dot(h1.astype(jnp.bfloat16), w2_ref[...],
                 preferred_element_type=jnp.float32) + b2_ref[...]
    h2 = jnp.maximum(h2, 0.0)

    # Layer 3 (out_features == 1): VPU multiply + lane reduction instead of an
    # MXU matmul with a single (padded) output lane.  b3 is an SMEM scalar.
    q = jnp.sum(h2 * w3_ref[...], axis=-1, keepdims=True) + b3_ref[0, 0]
    o_ref[...] = q.astype(o_ref.dtype)


def critic_forward(x, u, params):
    """x: (B, state_dim), u: (B, action_dim) -> (B, 1) float32."""
    w1x, w1u, b1, w2, b2, w3, b3 = params
    B, state_dim = x.shape
    action_dim = u.shape[1]
    h1p = w1x.shape[1]          # padded hidden sizes (512 / 384)
    h2p = w2.shape[1]

    # One grid step for typical DDPG batches; 1024-row parallel steps beyond.
    TB = _round_up(min(B, 1024), 8)
    Bp = _round_up(B, TB)
    if Bp != B:
        x = jnp.pad(x, ((0, Bp - B), (0, 0)))
        u = jnp.pad(u, ((0, Bp - B), (0, 0)))
    grid = (Bp // TB,)

    def act_spec(feat):
        return pl.BlockSpec((TB, feat), lambda i: (i, 0))

    def wspec(shape):
        # Constant block index -> weights stay VMEM-resident across grid steps.
        return pl.BlockSpec(shape, lambda i: (0, 0))

    smem_spec = pl.BlockSpec((1, 1), lambda i: (0, 0),
                             memory_space=pltpu.MemorySpace.SMEM)

    in_specs = [
        act_spec(state_dim),            # x
        act_spec(action_dim),           # u
        wspec((state_dim, h1p)),        # w1_x
        wspec((action_dim, h1p)),       # w1_u
        wspec((1, h1p)),                # b1
        wspec((h1p, h2p)),              # w2
        wspec((1, h2p)),                # b2
        wspec((1, h2p)),                # w3 (row form)
        smem_spec,                      # b3 scalar
    ]
    out_specs = act_spec(1)

    weight_bytes = sum(int(a.size) * a.dtype.itemsize
                       for a in (w1x, w1u, b1, w2, b2, w3, b3))
    act_bytes = (int(x.size) + int(u.size) + Bp) * 4
    cost = pl.CostEstimate(
        flops=2 * Bp * ((state_dim + action_dim) * h1p + h1p * h2p + h2p),
        transcendentals=0,
        bytes_accessed=weight_bytes + act_bytes,
    )

    out = pl.pallas_call(
        critic_kernel,
        out_shape=jax.ShapeDtypeStruct((Bp, 1), jnp.float32),
        grid=grid,
        in_specs=in_specs,
        out_specs=out_specs,
        compiler_params=pltpu.CompilerParams(
            dimension_semantics=("parallel",)),
        cost_estimate=cost,
    )(x, u, w1x, w1u, b1, w2, b2, w3, b3)

    if Bp != B:
        out = out[:B]
    return out


def init_critic_params(key, state_dim, action_dim):
    """Deterministic init mimicking PyTorch nn.Linear default:
    U(-1/sqrt(fan_in), 1/sqrt(fan_in)) for weight and bias (fan_in taken at
    the TRUE, unpadded sizes).  Weights stored as (in_features, out_features);
    hidden dims zero-padded 400->512 / 300->384 (exactly preserves numerics);
    w1 pre-split into x/u halves; w1/w2 cast to bf16; w3 kept as a (1, 384)
    f32 row for the VPU reduction; b3 is a (1, 1) f32 scalar for SMEM."""
    dims = [(state_dim + action_dim, H1), (H1, H2), (H2, 1)]
    raw = []
    for fan_in, fan_out in dims:
        key, kw, kb = jax.random.split(key, 3)
        bound = 1.0 / float(fan_in) ** 0.5
        w = jax.random.uniform(kw, (fan_in, fan_out), jnp.float32, -bound, bound)
        b = jax.random.uniform(kb, (1, fan_out), jnp.float32, -bound, bound)
        raw += [w, b]
    w1, b1, w2, b2, w3, b3 = raw

    d1 = H1_PAD - H1
    d2 = H2_PAD - H2
    w1 = jnp.pad(w1, ((0, 0), (0, d1)))      # extra h1 cols are zero
    b1 = jnp.pad(b1, ((0, 0), (0, d1)))      # -> relu(0) = 0
    w2 = jnp.pad(w2, ((0, d1), (0, d2)))     # zero rows kill padded h1, zero cols pad h2
    b2 = jnp.pad(b2, ((0, 0), (0, d2)))
    w3 = jnp.pad(w3, ((0, d2), (0, 0)))      # padded h2 contributes 0 to q

    w1x = w1[:state_dim].astype(jnp.bfloat16)
    w1u = w1[state_dim:].astype(jnp.bfloat16)
    w2 = w2.astype(jnp.bfloat16)
    w3_row = w3.T              # (1, H2_PAD) f32
    b3 = b3.reshape(1, 1)      # (1, 1) f32 scalar for SMEM
    return (w1x, w1u, b1, w2, b2, w3_row, b3)


def critic_reference(x, u, params):
    """Pure-JAX reference mirroring the kernel's numerics (bf16 MXU inputs,
    f32 accumulation).  Padded weight columns/rows are zero, so this equals
    the unpadded network."""
    w1x, w1u, b1, w2, b2, w3, b3 = params
    h1 = (jnp.dot(x.astype(jnp.bfloat16), w1x, preferred_element_type=jnp.float32)
          + jnp.dot(u.astype(jnp.bfloat16), w1u, preferred_element_type=jnp.float32)
          + b1)
    h1 = jnp.maximum(h1, 0.0)
    h2 = jnp.dot(h1.astype(jnp.bfloat16), w2,
                 preferred_element_type=jnp.float32) + b2
    h2 = jnp.maximum(h2, 0.0)
    return jnp.sum(h2 * w3, axis=-1, keepdims=True) + b3


if __name__ == "__main__":
    state_dim, action_dim, batch = 16, 8, 2

    key = jax.random.PRNGKey(0)
    kx, ku, kp = jax.random.split(key, 3)
    x = jax.random.normal(kx, (batch, state_dim), jnp.float32)
    u = jax.random.normal(ku, (batch, action_dim), jnp.float32)
    params = init_critic_params(kp, state_dim, action_dim)

    q = critic_forward(x, u, params)
    jax.block_until_ready(q)

    q_ref = critic_reference(x, u, params)
    assert q.shape == (batch, 1)
    assert jnp.allclose(q, q_ref, atol=1e-2, rtol=1e-2)

    print("KERNEL_OK")
</pallas_src>

<mosaic_0001>
module attributes {stable_mosaic.version = 11 : i64} {
  func.func @critic_kernel(%arg0: i32, %arg1: memref<8x16xf32, #tpu.memory_space<vmem>>, %arg2: memref<8x8xf32, #tpu.memory_space<vmem>>, %arg3: memref<16x512xbf16, #tpu.memory_space<vmem>>, %arg4: memref<8x512xbf16, #tpu.memory_space<vmem>>, %arg5: memref<1x512xf32, #tpu.memory_space<vmem>>, %arg6: memref<512x384xbf16, #tpu.memory_space<vmem>>, %arg7: memref<1x384xf32, #tpu.memory_space<vmem>>, %arg8: memref<1x384xf32, #tpu.memory_space<vmem>>, %arg9: memref<1x1xf32, #tpu.memory_space<smem>>, %arg10: memref<8x1xf32, #tpu.memory_space<vmem>>) attributes {dimension_semantics = [#tpu.dimension_semantics<parallel>], iteration_bounds = array<i64: 1>, scalar_prefetch = 0 : i64, scratch_operands = 0 : i64, tpu.core_type = #tpu.core_type<tc>, window_params = [{transform_indices = @transform_0, window_bounds = array<i64: 8, 16>}, {transform_indices = @transform_1, window_bounds = array<i64: 8, 8>}, {pipeline_mode = #tpu.pipeline_mode<synchronous>, transform_indices = @transform_2, window_bounds = array<i64: 16, 512>}, {pipeline_mode = #tpu.pipeline_mode<synchronous>, transform_indices = @transform_3, window_bounds = array<i64: 8, 512>}, {pipeline_mode = #tpu.pipeline_mode<synchronous>, transform_indices = @transform_4, window_bounds = array<i64: 1, 512>}, {pipeline_mode = #tpu.pipeline_mode<synchronous>, transform_indices = @transform_5, window_bounds = array<i64: 512, 384>}, {pipeline_mode = #tpu.pipeline_mode<synchronous>, transform_indices = @transform_6, window_bounds = array<i64: 1, 384>}, {pipeline_mode = #tpu.pipeline_mode<synchronous>, transform_indices = @transform_7, window_bounds = array<i64: 1, 384>}, {transform_indices = @transform_8, window_bounds = array<i64: 1, 1>}, {transform_indices = @transform_9, window_bounds = array<i64: 8, 1>}]} {
    %c0 = arith.constant 0 : index
    %c0_0 = arith.constant 0 : index
    %0 = vector.load %arg1[%c0, %c0_0] : memref<8x16xf32, #tpu.memory_space<vmem>>, vector<8x16xf32>
    %1 = arith.truncf %0 : vector<8x16xf32> to vector<8x16xbf16>
    %c0_1 = arith.constant 0 : index
    %c0_2 = arith.constant 0 : index
    %2 = vector.load %arg2[%c0_1, %c0_2] : memref<8x8xf32, #tpu.memory_space<vmem>>, vector<8x8xf32>
    %3 = arith.truncf %2 : vector<8x8xf32> to vector<8x8xbf16>
    %c0_3 = arith.constant 0 : index
    %c0_4 = arith.constant 0 : index
    %4 = vector.load %arg3[%c0_3, %c0_4] : memref<16x512xbf16, #tpu.memory_space<vmem>>, vector<16x512xbf16>
    %cst = arith.constant dense<0.000000e+00> : vector<8x512xf32>
    %5 = tpu.matmul %1, %4, %cst {dimension_numbers = #tpu.dot_dimension_numbers<[1], [0], [0], [1], [0, 0, 1, 1], [], []>} : vector<8x16xbf16>, vector<16x512xbf16>, vector<8x512xf32> -> vector<8x512xf32>
    %c0_5 = arith.constant 0 : index
    %c0_6 = arith.constant 0 : index
    %6 = vector.load %arg4[%c0_5, %c0_6] : memref<8x512xbf16, #tpu.memory_space<vmem>>, vector<8x512xbf16>
    %cst_7 = arith.constant dense<0.000000e+00> : vector<8x512xf32>
    %7 = tpu.matmul %3, %6, %cst_7 {dimension_numbers = #tpu.dot_dimension_numbers<[1], [0], [0], [1], [0, 0, 1, 1], [], []>} : vector<8x8xbf16>, vector<8x512xbf16>, vector<8x512xf32> -> vector<8x512xf32>
    %8 = arith.addf %5, %7 : vector<8x512xf32>
    %c0_8 = arith.constant 0 : index
    %c0_9 = arith.constant 0 : index
    %9 = vector.load %arg5[%c0_8, %c0_9] : memref<1x512xf32, #tpu.memory_space<vmem>>, vector<1x512xf32>
    %10 = vector.broadcast %9 : vector<1x512xf32> to vector<8x512xf32>
    %11 = arith.addf %8, %10 : vector<8x512xf32>
    %cst_10 = arith.constant 0.000000e+00 : f32
    %12 = vector.broadcast %cst_10 : f32 to vector<8x512xf32>
    %13 = arith.maximumf %11, %12 : vector<8x512xf32>
    %14 = arith.truncf %13 : vector<8x512xf32> to vector<8x512xbf16>
    %c0_11 = arith.constant 0 : index
    %c0_12 = arith.constant 0 : index
    %15 = vector.load %arg6[%c0_11, %c0_12] : memref<512x384xbf16, #tpu.memory_space<vmem>>, vector<512x384xbf16>
    %cst_13 = arith.constant dense<0.000000e+00> : vector<8x384xf32>
    %16 = tpu.matmul %14, %15, %cst_13 {dimension_numbers = #tpu.dot_dimension_numbers<[1], [0], [0], [1], [0, 0, 1, 1], [], []>} : vector<8x512xbf16>, vector<512x384xbf16>, vector<8x384xf32> -> vector<8x384xf32>
    %c0_14 = arith.constant 0 : index
    %c0_15 = arith.constant 0 : index
    %17 = vector.load %arg7[%c0_14, %c0_15] : memref<1x384xf32, #tpu.memory_space<vmem>>, vector<1x384xf32>
    %18 = vector.broadcast %17 : vector<1x384xf32> to vector<8x384xf32>
    %19 = arith.addf %16, %18 : vector<8x384xf32>
    %cst_16 = arith.constant 0.000000e+00 : f32
    %20 = vector.broadcast %cst_16 : f32 to vector<8x384xf32>
    %21 = arith.maximumf %19, %20 : vector<8x384xf32>
    %c0_17 = arith.constant 0 : index
    %c0_18 = arith.constant 0 : index
    %22 = vector.load %arg8[%c0_17, %c0_18] : memref<1x384xf32, #tpu.memory_space<vmem>>, vector<1x384xf32>
    %23 = vector.broadcast %22 : vector<1x384xf32> to vector<8x384xf32>
    %24 = arith.mulf %21, %23 : vector<8x384xf32>
    %cst_19 = arith.constant dense<0.000000e+00> : vector<8xf32>
    %25 = vector.multi_reduction <add>, %24, %cst_19 [1] : vector<8x384xf32> to vector<8xf32>
    %26 = vector.shape_cast %25 : vector<8xf32> to vector<8x1xf32>
    %c0_20 = arith.constant 0 : index
    %c0_21 = arith.constant 0 : index
    %27 = memref.load %arg9[%c0_20, %c0_21] : memref<1x1xf32, #tpu.memory_space<smem>>
    %28 = vector.broadcast %27 : f32 to vector<8x1xf32>
    %29 = arith.addf %26, %28 : vector<8x1xf32>
    %c0_22 = arith.constant 0 : index
    %c0_23 = arith.constant 0 : index
    %30 = vector.load %arg10[%c0_22, %c0_23] : memref<8x1xf32, #tpu.memory_space<vmem>>, vector<8x1xf32>
    tpu.vector_store %arg10[%c0_22, %c0_23], %29 {strides = array<i32>} : memref<8x1xf32, #tpu.memory_space<vmem>>, vector<8x1xf32>,
    return
  }
  func.func @transform_0(%arg0: i32) -> (i32, i32) {
    %c0_i32 = arith.constant 0 : i32
    %c0_i32_0 = arith.constant 0 : i32
    return %arg0, %c0_i32 : i32, i32
  }
  func.func @transform_1(%arg0: i32) -> (i32, i32) {
    %c0_i32 = arith.constant 0 : i32
    %c0_i32_0 = arith.constant 0 : i32
    return %arg0, %c0_i32 : i32, i32
  }
  func.func @transform_2(%arg0: i32) -> (i32, i32) {
    %c0_i32 = arith.constant 0 : i32
    %c0_i32_0 = arith.constant 0 : i32
    %c0_i32_1 = arith.constant 0 : i32
    return %c0_i32, %c0_i32_0 : i32, i32
  }
  func.func @transform_3(%arg0: i32) -> (i32, i32) {
    %c0_i32 = arith.constant 0 : i32
    %c0_i32_0 = arith.constant 0 : i32
    %c0_i32_1 = arith.constant 0 : i32
    return %c0_i32, %c0_i32_0 : i32, i32
  }
  func.func @transform_4(%arg0: i32) -> (i32, i32) {
    %c0_i32 = arith.constant 0 : i32
    %c0_i32_0 = arith.constant 0 : i32
    %c0_i32_1 = arith.constant 0 : i32
    return %c0_i32, %c0_i32_0 : i32, i32
  }
  func.func @transform_5(%arg0: i32) -> (i32, i32) {
    %c0_i32 = arith.constant 0 : i32
    %c0_i32_0 = arith.constant 0 : i32
    %c0_i32_1 = arith.constant 0 : i32
    return %c0_i32, %c0_i32_0 : i32, i32
  }
  func.func @transform_6(%arg0: i32) -> (i32, i32) {
    %c0_i32 = arith.constant 0 : i32
    %c0_i32_0 = arith.constant 0 : i32
    %c0_i32_1 = arith.constant 0 : i32
    return %c0_i32, %c0_i32_0 : i32, i32
  }
  func.func @transform_7(%arg0: i32) -> (i32, i32) {
    %c0_i32 = arith.constant 0 : i32
    %c0_i32_0 = arith.constant 0 : i32
    %c0_i32_1 = arith.constant 0 : i32
    return %c0_i32, %c0_i32_0 : i32, i32
  }
  func.func @transform_8(%arg0: i32) -> (i32, i32) {
    %c0_i32 = arith.constant 0 : i32
    %c0_i32_0 = arith.constant 0 : i32
    %c0_i32_1 = arith.constant 0 : i32
    return %c0_i32, %c0_i32_0 : i32, i32
  }
  func.func @transform_9(%arg0: i32) -> (i32, i32) {
    %c0_i32 = arith.constant 0 : i32
    %c0_i32_0 = arith.constant 0 : i32
    return %arg0, %c0_i32 : i32, i32
  }
}

</mosaic_0001>

<bundles_post_ra>
// kernel: tpu_custom_call.1
= control target key start
LH: loop header
LB: loop body
LE: loop exit
PB: predicated region body
PF: predicated region fallthrough
CT: control target
= control target key end

     0   :  { %15 = vsyncpa [#allocation4], 0  ;;  %s1810_s0 = inlined_call_operand.hbm [shape: f32[8,16], index: 0, kind: input, shape index: {}]   ;;  %s1811_s1 = inlined_call_operand.hbm [shape: f32[8,8], index: 1, kind: input, shape index: {}]   ;;  %s1812_s2 = inlined_call_operand.hbm [shape: bf16[16,512], index: 2, kind: input, shape index: {}]   ;;  %s1813_s3 = inlined_call_operand.hbm [shape: bf16[8,512], index: 3, kind: input, shape index: {}]   ;;  %s1814_s4 = inlined_call_operand.vmem [shape: f32[1,512], index: 4, kind: input, shape index: {}]   ;;  %s1815_s5 = inlined_call_operand.hbm [shape: bf16[512,384], index: 5, kind: input, shape index: {}]   ;;  %s1816_s6 = inlined_call_operand.vmem [shape: f32[1,384], index: 6, kind: input, shape index: {}]   ;;  %s1817_s7 = inlined_call_operand.vmem [shape: f32[1,384], index: 7, kind: input, shape index: {}]   ;;  %s1818_s8 = inlined_call_operand.<no memory space> [shape: f32[1,1], index: 8, kind: input, shape index: {}]   ;;  %s1819_s9 = inlined_call_operand.vmem [shape: f32[8,1], index: 9, kind: output, shape index: {}]  }
   0x1   :  { %16 = vsyncpa [#allocation6], 0 }
   0x2   :  { %17 = vsyncpa [#allocation9], 0  ;;  %s1637_s30 = smov [#allocation5]   ;;  %s1638_s11 = smov [#allocation8]  }
   0x3   :  { %s34_s10 = sshll.u32 %s1637_s30, 4  ;;  %s56_s12 = sshll.u32 %s1638_s11, 4  ;;  %s35_s10 = int_to_ptr.vmem [resolvable:$true] %s34_s10  ;;  %s57_s12 = int_to_ptr.vmem [resolvable:$true] %s56_s12 }
   0x4   :  { %s1521_s15 = scalar_lea.hbm %s1811_s1, 128 }
   0x5   :  { %p1522_p0 = scmp.ne.s32.totalorder %s1811_s1, %s1521_s15  ;;  %p1525_p1 = scmp.lt.u32.totalorder %s1521_s15, %s1811_s1 }
   0x7   :  { %p1527_p2 = pnand %p1525_p1, %p1522_p0 }
   0x9   :  { %1530 = shalt.err (!%p1527_p2)
}
   0xa   :  { %s1531_s20 = scalar_lea.vmem %s35_s10, 128  ;;  %p1536_p4 = scmp.lt.s32.totalorder %s35_s10, %s35_s10 }
   0xb   :  { %p1532_p3 = scmp.ne.s32.totalorder %s35_s10, %s1531_s20  ;;  %p1537_p5 = scmp.lt.s32.totalorder %s1531_s20, %s1531_s20 }
   0xd   :  { %p1538_p6 = por %p1537_p5, %p1536_p4 }
   0xf   :  { %p1539_p7 = pnand %p1538_p6, %p1532_p3 }
  0x11   :  { %1542 = shalt.err (!%p1539_p7)
}
  0x12   :  { %37 = dma.hbm_to_vmem [thread:$0]  %s1811_s1, 128, %s35_s10, [#allocation6]  }
  0x13   :  { %s1543_s25 = scalar_lea.hbm %s1813_s3, 256 }
  0x14   :  { %p1544_p8 = scmp.ne.s32.totalorder %s1813_s3, %s1543_s25  ;;  %p1547_p9 = scmp.lt.u32.totalorder %s1543_s25, %s1813_s3 }
  0x16   :  { %p1549_p10 = pnand %p1547_p9, %p1544_p8 }
  0x18   :  { %1552 = shalt.err (!%p1549_p10)
}
  0x19   :  { %s1553_s30 = scalar_lea.vmem %s57_s12, 256  ;;  %p1558_p12 = scmp.lt.s32.totalorder %s57_s12, %s57_s12 }
  0x1a   :  { %p1554_p11 = scmp.ne.s32.totalorder %s57_s12, %s1553_s30  ;;  %p1559_p13 = scmp.lt.s32.totalorder %s1553_s30, %s1553_s30 }
  0x1c   :  { %p1560_p0 = por %p1559_p13, %p1558_p12 }
  0x1e   :  { %p1561_p1 = pnand %p1560_p0, %p1554_p11 }
  0x20   :  { %1564 = shalt.err (!%p1561_p1)
}
  0x21   :  { %59 = dma.hbm_to_vmem [thread:$0]  %s1813_s3, 256, %s57_s12, [#allocation9]  }
  0x22   :  { %s1639_s11 = smov [#allocation3]   ;;  %s1640_s14 = smov [#allocation7]  }
  0x23   :  { %s24_s13 = sshll.u32 %s1639_s11, 4  ;;  %s43_s15 = sshll.u32 %s1640_s14, 4  ;;  %s25_s13 = int_to_ptr.vmem [resolvable:$true] %s24_s13  ;;  %s1721_s15 = int_to_ptr.vmem [resolvable:$true] %s43_s15 }
  0x24   :  { %s1565_s18 = scalar_lea.hbm %s1810_s0, 128 }
  0x25   :  { %p1566_p2 = scmp.ne.s32.totalorder %s1810_s0, %s1565_s18  ;;  %p1569_p3 = scmp.lt.u32.totalorder %s1565_s18, %s1810_s0 }
  0x27   :  { %p1571_p4 = pnand %p1569_p3, %p1566_p2 }
  0x29   :  { %1574 = shalt.err (!%p1571_p4)
}
  0x2a   :  { %s1575_s3 = scalar_lea.vmem %s25_s13, 128  ;;  %p1580_p6 = scmp.lt.s32.totalorder %s25_s13, %s25_s13 }
  0x2b   :  { %p1576_p5 = scmp.ne.s32.totalorder %s25_s13, %s1575_s3  ;;  %p1581_p7 = scmp.lt.s32.totalorder %s1575_s3, %s1575_s3 }
  0x2d   :  { %p1582_p8 = por %p1581_p7, %p1580_p6 }
  0x2f   :  { %p1583_p9 = pnand %p1582_p8, %p1576_p5 }
  0x31   :  { %1586 = shalt.err (!%p1583_p9)
}
  0x32   :  { %27 = dma.hbm_to_vmem [thread:$0]  %s1810_s0, 128, %s25_s13, [#allocation4]  }
  0x33   :  { %s1587_s26 = scalar_lea.hbm %s1812_s2, 512 }
  0x34   :  { %p1588_p10 = scmp.ne.s32.totalorder %s1812_s2, %s1587_s26  ;;  %p1591_p11 = scmp.lt.u32.totalorder %s1587_s26, %s1812_s2 }
  0x36   :  { %p1593_p12 = pnand %p1591_p11, %p1588_p10 }
  0x38   :  { %1596 = shalt.err (!%p1593_p12)
}
  0x39   :  { %s1597_s1 = scalar_lea.vmem %s1721_s15, 512  ;;  %p1602_p0 = scmp.lt.s32.totalorder %s1721_s15, %s1721_s15 }
  0x3a   :  { %p1598_p13 = scmp.ne.s32.totalorder %s1721_s15, %s1597_s1  ;;  %p1603_p1 = scmp.lt.s32.totalorder %s1597_s1, %s1597_s1 }
  0x3c   :  { %p1604_p2 = por %p1603_p1, %p1602_p0 }
  0x3e   :  { %p1605_p3 = pnand %p1604_p2, %p1598_p13 }
  0x40   :  { %1608 = shalt.err (!%p1605_p3)
}
  0x41   :  { %s1641_s0 = smov 256   ;;  %s1642_s10 = smov 16  }
  0x42   :  { %49 = dma.hbm_to_vmem [thread:$0]  %s1812_s2, 512, %s1721_s15, [#allocation6], %s1641_s0, %s1641_s0, %s1642_s10  }
  0x43   :  { %s1643_s14 = smov [#allocation10]   ;;  %s1609_s19 = scalar_lea.hbm %s1815_s5, 12288 }
  0x44   :  { %s67_s16 = sshll.u32 %s1643_s14, 4  ;;  %p1610_p4 = scmp.ne.s32.totalorder %s1815_s5, %s1609_s19  ;;  %s68_s16 = int_to_ptr.vmem [resolvable:$true] %s67_s16 }
  0x45   :  { %p1613_p5 = scmp.lt.u32.totalorder %s1609_s19, %s1815_s5 }
  0x47   :  { %p1615_p6 = pnand %p1613_p5, %p1610_p4 }
  0x49   :  { %1618 = shalt.err (!%p1615_p6)
}
  0x4a   :  { %s1619_s12 = scalar_lea.vmem %s68_s16, 12288  ;;  %p1624_p8 = scmp.lt.s32.totalorder %s68_s16, %s68_s16 }
  0x4b   :  { %p1620_p7 = scmp.ne.s32.totalorder %s68_s16, %s1619_s12  ;;  %p1625_p9 = scmp.lt.s32.totalorder %s1619_s12, %s1619_s12 }
  0x4d   :  { %p1626_p10 = por %p1625_p9, %p1624_p8 }
  0x4f   :  { %p1627_p11 = pnand %p1626_p10, %p1620_p7 }
  0x51   :  { %1630 = shalt.err (!%p1627_p11)
}
  0x52   :  { %s1644_s2 = smov 192   ;;  %s1645_s15 = smov 12  }
  0x53   :  { %73 = dma.hbm_to_vmem [thread:$0]  %s1815_s5, 12288, %s68_s16, [#allocation9], %s1644_s2, %s1644_s2, %s1645_s15  }
  0x54   :  { %1631 = dma.done.wait [#allocation4], 128  }
  0x55   :  { %1632 = vsyncadd [#allocation4], 4294967168 }
  0x56   :  { %1633 = dma.done.wait [#allocation6], 640  }
  0x57   :  { %1634 = vsyncadd [#allocation6], 4294966656 }
  0x58   :  { %1635 = dma.done.wait [#allocation9], 12544  }
  0x59   :  { %1636 = vsyncadd [#allocation9], 4294954752  ;;  %v1646_v0 = vmov 0   ;;  %v104_v1 = vld [vmem:[#allocation8] sm:$0xff]  ;;  %vm120_vm0 = vcmask 1043456   ;;  %v98_v2 = vld [vmem:[#allocation5] sm:$0xff] }
  0x5a   :  { %165 = vmatprep.mubr.bf16.mxu1 %v1646_v0  ;;  %v105_v3 = vld [vmem:[#allocation8 + $0x8] sm:$0xff]  ;;  %v1214_v4 = vcombine.high %v104_v1, %v104_v1  ;;  %v1213_v5 = vcombine.low %v104_v1, %v104_v1  ;;  %v99_v9 = vpack.c.bf16 %v98_v2, %v98_v2  ;;  %v1389_v10 = vld [vmem:[#allocation7 + $0x4] ss:$16 sps:$4 sm:$0xff]   ;;  %vm116_vm1 = vcmask 64512   ;;  %v1395_v13 = vld [vmem:[#allocation10] ss:$12 sps:$4 sm:$0xff]  }
  0x5b   :  { %v1216_v6 = vcombine.high %v105_v3, %v105_v3  ;;  %v1215_v7 = vcombine.low %v105_v3, %v105_v3  ;;  %v1393_v11 = vld [vmem:[#allocation10 + $0x4] ss:$12 sps:$4 sm:$0xff]   ;;  %v1396_v14 = vld [vmem:[#allocation10 + $0x1c] ss:$12 sps:$4 sm:$0xff]   ;;  %v1399_v16 = vld [vmem:[#allocation10 + $0x34] ss:$12 sps:$4 sm:$0xff]  }
  0x5c   :  { %1217 = vmatprep.subr.msk.bf16.mxu1 %vm120_vm0, %v1214_v4  ;;  %v122_v8 = vsel %vm120_vm0, %v1213_v5, 0  ;;  %1012 = vmatprep.subr.bf16.mxu0 %v1393_v11  ;;  %v1398_v15 = vld [vmem:[#allocation10 + $0x18] ss:$12 sps:$4 sm:$0xff]   ;;  %v1387_v17 = vld [vmem:[#allocation7] ss:$16 sps:$4 sm:$0xff]   ;;  %vm235_vm2 = vcmask 130048  }
  0x5d   :  { %134 = vmatpush1.bf16.msra.mxu1 %v122_v8  ;;  %v128_v12 = vsel %vm120_vm0, %v1215_v7, 0  ;;  %1013 = vmatpush1.bf16.msra.mxu0 %v1395_v13  ;;  %v1401_v18 = vld [vmem:[#allocation10 + $0x30] ss:$12 sps:$4 sm:$0xff]   ;;  %v1402_v20 = vld [vmem:[#allocation10 + $0x4c] ss:$12 sps:$4 sm:$0xff]   ;;  %v96_v22 = vld [vmem:[#allocation3] sm:$0xff]  ;;  %v323_v7 = vlaneseq }
  0x5e   :  { %1219 = vmatprep.subr.msk.bf16.mxu1 %vm120_vm0, %v1216_v6  ;;  %1014 = vmatprep.subr.bf16.mxu0 %v1396_v14  ;;  %v1392_v19 = vld [vmem:[#allocation7 + $0xc] ss:$16 sps:$4 sm:$0xff]   ;;  %v1404_v21 = vld [vmem:[#allocation10 + $0x48] ss:$12 sps:$4 sm:$0xff]   ;;  %v1405_v23 = vld [vmem:[#allocation10 + $0x64] ss:$12 sps:$4 sm:$0xff]   ;;  %v97_v25 = vpack.c.bf16 %v96_v22, %v96_v22 }
  0x5f   :  { %v1390_v24 = vld [vmem:[#allocation7 + $0x8] ss:$16 sps:$4 sm:$0xff]   ;;  %v1407_v26 = vld [vmem:[#allocation10 + $0x60] ss:$12 sps:$4 sm:$0xff]   ;;  %v1413_v31 = vld [vmem:[#allocation10 + $0x90] ss:$12 sps:$4 sm:$0xff]  }
  0x60   :  { %1218 = vmatmul.mubr.msk.bf16.vlgmr.msra.gmra.mrb[0].mxu1 %vm116_vm1, %v99_v9  ;;  %v1408_v27 = vld [vmem:[#allocation10 + $0x7c] ss:$12 sps:$4 sm:$0xff]   ;;  %v1410_v28 = vld [vmem:[#allocation10 + $0x78] ss:$12 sps:$4 sm:$0xff]   ;;  %v1411_v30 = vld [vmem:[#allocation10 + $0x94] ss:$12 sps:$4 sm:$0xff]  }
  0x61   :  { %175 = vmatpush1.bf16.msra.mxu1 %v128_v12  ;;  %206 = vmatprep.mubr.bf16.mxu1 %v1646_v0  ;;  %v1419_v29 = vld [vmem:[#allocation10 + $0xc8] ss:$12 sps:$4 sm:$0xff]   ;;  %v1414_v32 = vld [vmem:[#allocation10 + $0xac] ss:$12 sps:$4 sm:$0xff]   ;;  %v1417_v36 = vld [vmem:[#allocation10 + $0xc4] ss:$12 sps:$4 sm:$0xff]  }
  0x62   :  { %239 = vmatprep.subr.bf16.mxu1 %v1389_v10  ;;  %1015 = vmatpush1.bf16.msra.mxu0 %v1398_v15  ;;  %v1421_v33 = vld [vmem:[#allocation10 + $0x8] ss:$12 sps:$4 sm:$0xff]   ;;  %v1424_v34 = vld [vmem:[#allocation10 + $0xe0] ss:$12 sps:$4 sm:$0xff]   ;;  %v1425_v40 = vld [vmem:[#allocation10 + $0xd8] ss:$12 sps:$4 sm:$0xff]  }
  0x63   :  { %1016 = vmatprep.subr.bf16.mxu0 %v1399_v16  ;;  %v1416_v35 = vld [vmem:[#allocation10 + $0xa8] ss:$12 sps:$4 sm:$0xff]   ;;  %v1426_v37 = vld [vmem:[#allocation10 + $0x20] ss:$12 sps:$4 sm:$0xff]   ;;  %v1429_v42 = vld [vmem:[#allocation10 + $0xf8] ss:$12 sps:$4 sm:$0xff]  }
  0x64   :  { %v1420_v38 = vld [vmem:[#allocation10 + $0xc0] ss:$12 sps:$4 sm:$0xff]   ;;  %v1422_v39 = vld [vmem:[#allocation10 + $0xdc] ss:$12 sps:$4 sm:$0xff]   ;;  %v1431_v44 = vld [vmem:[#allocation10 + $0x38] ss:$12 sps:$4 sm:$0xff]  }
  0x65   :  { %v1427_v41 = vld [vmem:[#allocation10 + $0xf4] ss:$12 sps:$4 sm:$0xff]   ;;  %v1430_v43 = vld [vmem:[#allocation10 + $0xf0] ss:$12 sps:$4 sm:$0xff]   ;;  %v1432_v45 = vld [vmem:[#allocation10 + $0x10c] ss:$12 sps:$4 sm:$0xff]  }
  0x66   :  { %1017 = vmatpush1.bf16.msra.mxu0 %v1401_v18  ;;  %v1434_v46 = vld [vmem:[#allocation10 + $0x110] ss:$12 sps:$4 sm:$0xff]   ;;  %v1435_v47 = vld [vmem:[#allocation10 + $0x108] ss:$12 sps:$4 sm:$0xff]   ;;  %v1440_v51 = vld [vmem:[#allocation10 + $0x120] ss:$12 sps:$4 sm:$0xff]  }
  0x67   :  { %1018 = vmatprep.subr.bf16.mxu0 %v1402_v20  ;;  %v1436_v48 = vld [vmem:[#allocation10 + $0x50] ss:$12 sps:$4 sm:$0xff]   ;;  %v1439_v50 = vld [vmem:[#allocation10 + $0x128] ss:$12 sps:$4 sm:$0xff]   ;;  %v1444_v54 = vld [vmem:[#allocation10 + $0x140] ss:$12 sps:$4 sm:$0xff]  }
  0x68   :  { %1220 = vmatmul.mubr.msk.bf16.vlgmr.msra.gmra.mrb[4].mxu1 %vm116_vm1, %v99_v9  ;;  %v1437_v49 = vld [vmem:[#allocation10 + $0x124] ss:$12 sps:$4 sm:$0xff]   ;;  %v1441_v52 = vld [vmem:[#allocation10 + $0x68] ss:$12 sps:$4 sm:$0xff]   ;;  %v1446_v56 = vld [vmem:[#allocation10 + $0x80] ss:$12 sps:$4 sm:$0xff]  }
  0x69   :  { %240 = vmatpush1.bf16.msra.mxu1 %v1387_v17  ;;  %271 = vmatprep.mubr.bf16.mxu1 %v1646_v0  ;;  %v1442_v53 = vld [vmem:[#allocation10 + $0x13c] ss:$12 sps:$4 sm:$0xff]   ;;  %v1445_v55 = vld [vmem:[#allocation10 + $0x138] ss:$12 sps:$4 sm:$0xff]   ;;  %v1447_v57 = vld [vmem:[#allocation10 + $0x154] ss:$12 sps:$4 sm:$0xff]  }
  0x6a   :  { %280 = vmatprep.subr.bf16.mxu1 %v1392_v19  ;;  %1019 = vmatpush1.bf16.msra.mxu0 %v1404_v21  ;;  %v1449_v58 = vld [vmem:[#allocation10 + $0x158] ss:$12 sps:$4 sm:$0xff]   ;;  %v1450_v59 = vld [vmem:[#allocation10 + $0x150] ss:$12 sps:$4 sm:$0xff]   ;;  %v1455_v63 = vld [vmem:[#allocation10 + $0x168] ss:$12 sps:$4 sm:$0xff]  }
  0x6b   :  { %1020 = vmatprep.subr.bf16.mxu0 %v1405_v23  ;;  %v1451_v60 = vld [vmem:[#allocation10 + $0x98] ss:$12 sps:$4 sm:$0xff]   ;;  %v1454_v62 = vld [vmem:[#allocation10 + $0x170] ss:$12 sps:$4 sm:$0xff]   ;;  %v1460_v2 = vld [vmem:[#allocation10 + $0x248] ss:$12 sps:$4 sm:$0xff]  }
  0x6c   :  { %v1452_v61 = vld [vmem:[#allocation10 + $0x16c] ss:$12 sps:$4 sm:$0xff]   ;;  %v1459_v1 = vld [vmem:[#allocation10 + $0x184] ss:$12 sps:$4 sm:$0xff]   ;;  %v1768_v8 = vshrl.u32 %v323_v7, 7  ;;  %vm1204_vm3 = vcmask 7168  }
  0x6d   :  { %v1776_v14 = vld [vmem:[%s1814_s4] sm:$0xf]  ;;  %v1495_v7 = vld [vmem:[#allocation10 + $0x2f0] ss:$12 sps:$4 sm:$0xff]  }
  0x6e   :  { %1021 = vmatpush1.bf16.msra.mxu0 %v1407_v26  ;;  %v1771_v13 = vsub.s32 0, %v1768_v8  ;;  %v1779_v15 = vsub.s32 1, %v1768_v8 }
  0x6f   :  { %1022 = vmatprep.subr.bf16.mxu0 %v1408_v27 }
  0x70   :  { %1225 = vmatmul.mubr.msk.bf16.vlgmr.msra.gmra.mrb[8].mxu1 %vm235_vm2, %v97_v25  ;;  %v326_v16 = vrot.slane %v1776_v14, %v1771_v13  ;;  %v330_v18 = vrot.slane %v1776_v14, %v1779_v15 }
  0x71   :  { %281 = vmatpush1.bf16.msra.mxu1 %v1390_v24  ;;  %312 = vmatprep.mubr.bf16.mxu1 %v1646_v0  ;;  %v1456_v0 = vld [vmem:[#allocation10 + $0xb0] ss:$12 sps:$4 sm:$0xff]  }
  0x72   :  { %1323 = vmatprep.subr.bf16.mxu1 %v1419_v29  ;;  %1023 = vmatpush1.bf16.msra.mxu0 %v1410_v28 }
  0x73   :  { %1024 = vmatprep.subr.bf16.mxu0 %v1411_v30 }
  0x76   :  { %1025 = vmatpush1.bf16.msra.mxu0 %v1413_v31 }
  0x77   :  { %1026 = vmatprep.subr.bf16.mxu0 %v1414_v32  ;;  %v1457_v32 = vld [vmem:[#allocation10 + $0x180] ss:$12 sps:$4 sm:$0xff]  }
  0x78   :  { %1226 = vmatmul.mubr.msk.bf16.vlgmr.msra.gmra.mrb[12].mxu1 %vm235_vm2, %v97_v25  ;;  %v337_v25 = vsub.s32 3, %v1768_v8 }
  0x79   :  { %1324 = vmatpush3.bf16.msra.mxu1 %v1421_v33  ;;  %v1461_v33 = vld [vmem:[#allocation10 + $0x188] ss:$12 sps:$4 sm:$0xff]  }
  0x7a   :  { %1325 = vmatprep.subr.bf16.mxu1 %v1424_v34  ;;  %1027 = vmatpush1.bf16.msra.mxu0 %v1416_v35  ;;  %v338_v30 = vrot.slane %v1776_v14, %v337_v25  ;;  %v1512_v25 = vld [vmem:[#allocation10 + $0x2b8] ss:$12 sps:$4 sm:$0xff]  }
  0x7b   :  { %1028 = vmatprep.subr.bf16.mxu0 %v1417_v36 }
  0x7d   :  { %1326 = vmatpush3.bf16.msra.mxu1 %v1426_v37  ;;  %v1464_v37 = vld [vmem:[#allocation10 + $0x19c] ss:$12 sps:$4 sm:$0xff]  }
  0x7e   :  { %1029 = vmatpush1.bf16.msra.mxu0 %v1420_v38  ;;  %1327 = vmatprep.subr.bf16.mxu1 %v1429_v42  ;;  %v1465_v38 = vld [vmem:[#allocation10 + $0x260] ss:$12 sps:$4 sm:$0xff]  }
  0x7f   :  { %1030 = vmatprep.subr.bf16.mxu0 %v1422_v39 }
  0x81   :  { %1328 = vmatpush3.bf16.msra.mxu1 %v1431_v44  ;;  %v1466_v44 = vld [vmem:[#allocation10 + $0x1a0] ss:$12 sps:$4 sm:$0xff]  }
  0x82   :  { %1031 = vmatpush1.bf16.msra.mxu0 %v1425_v40  ;;  %1329 = vmatprep.subr.bf16.mxu1 %v1434_v46  ;;  %v1470_v46 = vld [vmem:[#allocation10 + $0x278] ss:$12 sps:$4 sm:$0xff]  }
  0x83   :  { %1032 = vmatprep.subr.bf16.mxu0 %v1427_v41 }
  0x85   :  { %1330 = vmatpush3.bf16.msra.mxu1 %v1436_v48 }
  0x86   :  { %1033 = vmatpush1.bf16.msra.mxu0 %v1430_v43  ;;  %1331 = vmatprep.subr.bf16.mxu1 %v1439_v50  ;;  %v1462_v43 = vld [vmem:[#allocation10 + $0x198] ss:$12 sps:$4 sm:$0xff]  }
  0x87   :  { %1034 = vmatprep.subr.bf16.mxu0 %v1432_v45  ;;  %v1469_v45 = vld [vmem:[#allocation10 + $0x1b4] ss:$12 sps:$4 sm:$0xff]   ;;  %v1471_v50 = vld [vmem:[#allocation10 + $0x1b8] ss:$12 sps:$4 sm:$0xff]  }
  0x89   :  { %1332 = vmatpush3.bf16.msra.mxu1 %v1441_v52  ;;  %v1475_v52 = vld [vmem:[#allocation10 + $0x290] ss:$12 sps:$4 sm:$0xff]  }
  0x8a   :  { %1035 = vmatpush1.bf16.msra.mxu0 %v1435_v47  ;;  %1333 = vmatprep.subr.bf16.mxu1 %v1444_v54  ;;  %v1476_v54 = vld [vmem:[#allocation10 + $0x1d0] ss:$12 sps:$4 sm:$0xff]  }
  0x8b   :  { %1036 = vmatprep.subr.bf16.mxu0 %v1437_v49  ;;  %v1467_v49 = vld [vmem:[#allocation10 + $0x1b0] ss:$12 sps:$4 sm:$0xff]  }
  0x8d   :  { %1334 = vmatpush3.bf16.msra.mxu1 %v1446_v56  ;;  %v1480_v56 = vld [vmem:[#allocation10 + $0x2a8] ss:$12 sps:$4 sm:$0xff]  }
  0x8e   :  { %1037 = vmatpush1.bf16.msra.mxu0 %v1440_v51  ;;  %1335 = vmatprep.subr.bf16.mxu1 %v1449_v58  ;;  %v1474_v51 = vld [vmem:[#allocation10 + $0x1cc] ss:$12 sps:$4 sm:$0xff]   ;;  %v1481_v58 = vld [vmem:[#allocation10 + $0x1e8] ss:$12 sps:$4 sm:$0xff]  }
  0x8f   :  { %1038 = vmatprep.subr.bf16.mxu0 %v1442_v53  ;;  %v1472_v53 = vld [vmem:[#allocation10 + $0x1c8] ss:$12 sps:$4 sm:$0xff]  }
  0x91   :  { %1336 = vmatpush3.bf16.msra.mxu1 %v1451_v60  ;;  %v1484_v60 = vld [vmem:[#allocation10 + $0x1fc] ss:$12 sps:$4 sm:$0xff]  }
  0x92   :  { %1039 = vmatpush1.bf16.msra.mxu0 %v1445_v55  ;;  %1337 = vmatprep.subr.bf16.mxu1 %v1454_v62  ;;  %v1479_v55 = vld [vmem:[#allocation10 + $0x1e4] ss:$12 sps:$4 sm:$0xff]  }
  0x93   :  { %1040 = vmatprep.subr.bf16.mxu0 %v1447_v57  ;;  %v1477_v57 = vld [vmem:[#allocation10 + $0x1e0] ss:$12 sps:$4 sm:$0xff]   ;;  %v1482_v62 = vld [vmem:[#allocation10 + $0x1f8] ss:$12 sps:$4 sm:$0xff]  }
  0x95   :  { %1338 = vmatpush3.bf16.msra.mxu1 %v1456_v0 }
  0x96   :  { %1041 = vmatpush1.bf16.msra.mxu0 %v1450_v59  ;;  %1345 = vmatprep.subr.bf16.mxu1 %v1460_v2  ;;  %v1788_v59 = vsub.s32 2, %v1768_v8  ;;  %v1490_v2 = vld [vmem:[#allocation10 + $0x2d8] ss:$12 sps:$4 sm:$0xff]   ;;  %v1492_v8 = vld [vmem:[#allocation10 + $0x228] ss:$12 sps:$4 sm:$0xff]  }
  0x97   :  { %1042 = vmatprep.subr.bf16.mxu0 %v1452_v61  ;;  %v1485_v61 = vld [vmem:[#allocation10 + $0x2c0] ss:$12 sps:$4 sm:$0xff]  }
  0x98   :  { %v334_v0 = vrot.slane %v1776_v14, %v1788_v59 }
  0x9a   :  { %1043 = vmatpush1.bf16.msra.mxu0 %v1455_v63  ;;  %v1486_v63 = vld [vmem:[#allocation10 + $0x200] ss:$12 sps:$4 sm:$0xff]  }
  0x9b   :  { %1053 = vmatprep.subr.bf16.mxu0 %v1459_v1  ;;  %v1489_v1 = vld [vmem:[#allocation10 + $0x214] ss:$12 sps:$4 sm:$0xff]  }
 0x133   :  { %v167_v3 = vpop.f32.mrb[0].mxu1 }
 0x134   :  { %v169_v4 = vpop.f32.mrb[1].mxu1 }
 0x135   :  { %v171_v5 = vpop.f32.mrb[2].mxu1 }
 0x136   :  { %v172_v6 = vpop.f32.mrb[3].mxu1 }
 0x137   :  { %v1494_v6 = vld [vmem:[#allocation10 + $0x22c] ss:$12 sps:$4 sm:$0xff]  }
 0x13b   :  { %v208_v9 = vpop.f32.mrb[4].mxu1 }
 0x13c   :  { %v210_v10 = vpop.f32.mrb[5].mxu1 }
 0x13d   :  { %v212_v11 = vpop.f32.mrb[6].mxu1 }
 0x13e   :  { %v213_v12 = vpop.f32.mrb[7].mxu1  ;;  %v1499_v11 = vld [vmem:[#allocation10 + $0x244] ss:$12 sps:$4 sm:$0xff]  }
 0x13f   :  { %v1497_v12 = vld [vmem:[#allocation10 + $0x240] ss:$12 sps:$4 sm:$0xff]  }
 0x143   :  { %v273_v17 = vpop.f32.mrb[8].mxu1 }
 0x144   :  { %v274_v19 = vadd.f32 %v273_v17, %v167_v3  ;;  %v275_v20 = vpop.f32.mrb[9].mxu1  ;;  %v1487_v3 = vld [vmem:[#allocation10 + $0x210] ss:$12 sps:$4 sm:$0xff]   ;;  %v1500_v17 = vld [vmem:[#allocation10 + $0x258] ss:$12 sps:$4 sm:$0xff]  }
 0x145   :  { %v276_v21 = vadd.f32 %v275_v20, %v169_v4  ;;  %v277_v22 = vpop.f32.mrb[10].mxu1  ;;  %v1491_v4 = vld [vmem:[#allocation10 + $0x218] ss:$12 sps:$4 sm:$0xff]  }
 0x146   :  { %v343_v23 = vadd.f32 %v326_v16, %v274_v19  ;;  %v278_v24 = vpop.f32.mrb[11].mxu1  ;;  %v1502_v16 = vld [vmem:[#allocation10 + $0x25c] ss:$12 sps:$4 sm:$0xff]   ;;  %v1508_v20 = vld [vmem:[#allocation10 + $0x28c] ss:$12 sps:$4 sm:$0xff]  }
 0x147   :  { %v344_v26 = vadd.f32 %v330_v18, %v276_v21  ;;  %v1505_v18 = vld [vmem:[#allocation10 + $0x274] ss:$12 sps:$4 sm:$0xff]   ;;  %v1503_v19 = vld [vmem:[#allocation10 + $0x270] ss:$12 sps:$4 sm:$0xff]  }
 0x148   :  { %v347_v27 = vmax.f32 %v343_v23, 0.0  ;;  %v1506_v21 = vld [vmem:[#allocation10 + $0x288] ss:$12 sps:$4 sm:$0xff]   ;;  %v1511_v22 = vld [vmem:[#allocation10 + $0x2a4] ss:$12 sps:$4 sm:$0xff]  }
 0x149   :  { %v348_v28 = vmax.f32 %v344_v26, 0.0  ;;  %v1509_v23 = vld [vmem:[#allocation10 + $0x2a0] ss:$12 sps:$4 sm:$0xff]   ;;  %v1514_v24 = vld [vmem:[#allocation10 + $0x2bc] ss:$12 sps:$4 sm:$0xff]  }
 0x14a   :  { %v351_v34 = vpack.c.bf16 %v347_v27, %v347_v27  ;;  %v1517_v26 = vld [vmem:[#allocation10 + $0x2d4] ss:$12 sps:$4 sm:$0xff]   ;;  %v1515_v27 = vld [vmem:[#allocation10 + $0x2d0] ss:$12 sps:$4 sm:$0xff]  }
 0x14b   :  { %v314_v29 = vpop.f32.mrb[12].mxu1  ;;  %v352_v31 = vpack.c.bf16 %v348_v28, %v348_v28  ;;  %v1520_v28 = vld [vmem:[#allocation10 + $0x2ec] ss:$12 sps:$4 sm:$0xff]  }
 0x14c   :  { %v315_v35 = vadd.f32 %v314_v29, %v208_v9  ;;  %v316_v36 = vpop.f32.mrb[13].mxu1  ;;  %v1496_v9 = vld [vmem:[#allocation10 + $0x230] ss:$12 sps:$4 sm:$0xff]   ;;  %v1518_v29 = vld [vmem:[#allocation10 + $0x2e8] ss:$12 sps:$4 sm:$0xff]  }
 0x14d   :  { %v317_v39 = vadd.f32 %v316_v36, %v210_v10  ;;  %1044 = vmatprep.mubr.bf16.mxu0 %v352_v31  ;;  %1126 = vmatprep.mubr.bf16.mxu1 %v352_v31  ;;  %v318_v40 = vpop.f32.mrb[14].mxu1 }
 0x14e   :  { %1045 = vmatmul.mubr.bf16.vlgmr.msra.gmra.mrb[0].mxu0 %v351_v34  ;;  %1127 = vmatmul.mubr.bf16.vlgmr.msra.gmra.mrb[16].mxu1 %v351_v34  ;;  %v319_v41 = vpop.f32.mrb[15].mxu1  ;;  %v345_v5 = vadd.f32 %v334_v0, %v315_v35  ;;  %v483_v35 = vld [vmem:[%s1816_s6] sm:$0x7] }
 0x14f   :  { %v346_v42 = vadd.f32 %v338_v30, %v317_v39  ;;  %1054 = vmatpush1.bf16.msra.mxu0 %v1457_v32  ;;  %1346 = vmatpush3.bf16.msra.mxu1 %v1461_v33  ;;  %v496_v36 = vrot.slane %v483_v35, %v1788_v59 }
 0x150   :  { %1055 = vmatprep.subr.bf16.mxu0 %v1464_v37  ;;  %1347 = vmatprep.subr.bf16.mxu1 %v1465_v38  ;;  %v349_v10 = vmax.f32 %v345_v5, 0.0 }
 0x151   :  { %v350_v47 = vmax.f32 %v346_v42, 0.0 }
 0x152   :  { %v353_v14 = vpack.c.bf16 %v349_v10, %v349_v10 }
 0x153   :  { %v354_v48 = vpack.c.bf16 %v350_v47, %v350_v47  ;;  %1056 = vmatpush1.bf16.msra.mxu0 %v1462_v43  ;;  %1348 = vmatpush3.bf16.msra.mxu1 %v1466_v44  ;;  %v488_v44 = vrot.slane %v483_v35, %v1771_v13  ;;  %v1177_v47 = vld [vmem:[%s1817_s7] sm:$0x7] }
 0x154   :  { %1057 = vmatprep.subr.bf16.mxu0 %v1469_v45  ;;  %1349 = vmatprep.subr.bf16.mxu1 %v1470_v46  ;;  %v492_v45 = vrot.slane %v483_v35, %v1779_v15 }
 0x155   :  { %1085 = vmatprep.mubr.bf16.mxu0 %v354_v48  ;;  %1166 = vmatprep.mubr.bf16.mxu1 %v354_v48 }
 0x157   :  { %1058 = vmatpush1.bf16.msra.mxu0 %v1467_v49  ;;  %1350 = vmatpush3.bf16.msra.mxu1 %v1471_v50  ;;  %v1182_v49 = vrot.slane %v1177_v47, %v1771_v13  ;;  %v1202_v13 = vstv %s1818_s8 }
 0x158   :  { %1059 = vmatprep.subr.bf16.mxu0 %v1474_v51  ;;  %1351 = vmatprep.subr.bf16.mxu1 %v1475_v52  ;;  %v1186_v52 = vrot.slane %v1177_v47, %v1779_v15 }
 0x15b   :  { %1060 = vmatpush1.bf16.msra.mxu0 %v1472_v53  ;;  %1352 = vmatpush3.bf16.msra.mxu1 %v1476_v54 }
 0x15c   :  { %1061 = vmatprep.subr.bf16.mxu0 %v1479_v55  ;;  %1353 = vmatprep.subr.bf16.mxu1 %v1480_v56 }
 0x15f   :  { %1062 = vmatpush1.bf16.msra.mxu0 %v1477_v57  ;;  %1354 = vmatpush3.bf16.msra.mxu1 %v1481_v58  ;;  %v1190_v58 = vrot.slane %v1177_v47, %v1788_v59 }
 0x160   :  { %1063 = vmatprep.subr.bf16.mxu0 %v1484_v60  ;;  %1355 = vmatprep.subr.bf16.mxu1 %v1485_v61 }
 0x163   :  { %1064 = vmatpush1.bf16.msra.mxu0 %v1482_v62  ;;  %1356 = vmatpush3.bf16.msra.mxu1 %v1486_v63 }
 0x164   :  { %1065 = vmatprep.subr.bf16.mxu0 %v1489_v1  ;;  %1357 = vmatprep.subr.bf16.mxu1 %v1490_v2 }
 0x167   :  { %1066 = vmatpush1.bf16.msra.mxu0 %v1487_v3  ;;  %1358 = vmatpush3.bf16.msra.mxu1 %v1491_v4 }
 0x168   :  { %1067 = vmatprep.subr.bf16.mxu0 %v1494_v6  ;;  %1359 = vmatprep.subr.bf16.mxu1 %v1495_v7 }
 0x16b   :  { %1068 = vmatpush1.bf16.msra.mxu0 %v1492_v8  ;;  %1360 = vmatpush3.bf16.msra.mxu1 %v1496_v9 }
 0x16c   :  { %1069 = vmatprep.subr.bf16.mxu0 %v1499_v11 }
 0x16e   :  { %1167 = vmatmul.mubr.bf16.vlgmr.msra.gmra.mrb[20].mxu1 %v353_v14 }
 0x16f   :  { %1070 = vmatpush1.bf16.msra.mxu0 %v1497_v12 }
 0x170   :  { %1071 = vmatprep.subr.bf16.mxu0 %v1502_v16 }
 0x173   :  { %1072 = vmatpush1.bf16.msra.mxu0 %v1500_v17 }
 0x174   :  { %1073 = vmatprep.subr.bf16.mxu0 %v1505_v18 }
 0x177   :  { %1074 = vmatpush1.bf16.msra.mxu0 %v1503_v19 }
 0x178   :  { %1075 = vmatprep.subr.bf16.mxu0 %v1508_v20 }
 0x17b   :  { %1076 = vmatpush1.bf16.msra.mxu0 %v1506_v21 }
 0x17c   :  { %1077 = vmatprep.subr.bf16.mxu0 %v1511_v22 }
 0x17f   :  { %1078 = vmatpush1.bf16.msra.mxu0 %v1509_v23 }
 0x180   :  { %1079 = vmatprep.subr.bf16.mxu0 %v1514_v24 }
 0x183   :  { %1080 = vmatpush1.bf16.msra.mxu0 %v1512_v25 }
 0x184   :  { %1081 = vmatprep.subr.bf16.mxu0 %v1517_v26 }
 0x187   :  { %1082 = vmatpush1.bf16.msra.mxu0 %v1515_v27 }
 0x188   :  { %1083 = vmatprep.subr.bf16.mxu0 %v1520_v28 }
 0x18b   :  { %1084 = vmatpush1.bf16.msra.mxu0 %v1518_v29 }
 0x18e   :  { %1086 = vmatmul.mubr.bf16.vlgmr.msra.gmra.mrb[0].mxu0 %v353_v14 }
 0x221   :  { %v1339_v30 = vpop.f32.mrb[16].mxu1 }
 0x222   :  { %v1340_v31 = vpop.f32.mrb[17].mxu1 }
 0x223   :  { %v1341_v32 = vadd.f32 %v1340_v31, %v1339_v30  ;;  %v1342_v33 = vpop.f32.mrb[18].mxu1 }
 0x224   :  { %v1343_v34 = vpop.f32.mrb[19].mxu1 }
 0x225   :  { %v1129_v39 = vadd.f32 %v1341_v32, %v496_v36 }
 0x241   :  { %v1361_v37 = vpop.f32.mrb[20].mxu1 }
 0x242   :  { %v1362_v38 = vpop.f32.mrb[21].mxu1 }
 0x243   :  { %v1363_v40 = vadd.f32 %v1362_v38, %v1361_v37  ;;  %v1364_v41 = vpop.f32.mrb[22].mxu1 }
 0x244   :  { %v1365_v42 = vpop.f32.mrb[23].mxu1 }
 0x245   :  { %v1169_v43 = vadd.f32 %v1363_v40, %v1129_v39 }
 0x247   :  { %v1176_v56 = vmax.f32 %v1169_v43, 0.0 }
 0x249   :  { %v1196_v62 = vmul.f32 %v1190_v58, %v1176_v56 }
 0x261   :  { %v1087_v46 = vpop.f32.mrb[0].mxu0 }
 0x262   :  { %v1367_v48 = vadd.f32 %v1087_v46, %v488_v44  ;;  %v1089_v50 = vpop.f32.mrb[1].mxu0 }
 0x263   :  { %v1368_v51 = vadd.f32 %v1089_v50, %v492_v45  ;;  %v1091_v53 = vpop.f32.mrb[2].mxu0 }
 0x264   :  { %v1174_v54 = vmax.f32 %v1367_v48, 0.0  ;;  %v1092_v55 = vpop.f32.mrb[3].mxu0 }
 0x265   :  { %v1175_v57 = vmax.f32 %v1368_v51, 0.0 }
 0x266   :  { %v1194_v60 = vmul.f32 %v1182_v49, %v1174_v54 }
 0x267   :  { %v1195_v61 = vmul.f32 %v1186_v52, %v1175_v57 }
 0x269   :  { %v1197_v63 = vadd.f32 %v1195_v61, %v1194_v60 }
 0x26b   :  { %v1198_v0 = vadd.f32 %v1197_v63, %v1196_v62 }
 0x26d   :  { %1199 = vadd.xlane.f32.xlu0 %v1198_v0 }
 0x2fa   :  { %v1200_v1 = vpop.xlane.xlu0 %1199 }
 0x2fb   :  { %v1203_v15 = vadd.f32 %v1202_v13, %v1200_v1 }
 0x2fd   :  { %1205 = vst.msk [vmem:[%s1819_s9] sm:$0xff] %vm1204_vm3, %v1203_v15 }
 0x2fe   :  { %1210 = vsyncpa [#allocation4], 1 }
 0x2ff   :  { %1211 = vsyncpa [#allocation6], 1 }
 0x300   :  { %1212 = vsyncpa [#allocation9], 1 }

</bundles_post_ra>
